<compile_context>
chip_gen: v5e
topology: v5e:2x2
jax: 0.10.0
libtpu: 0.0.40
codegen_flags: <defaults>
</compile_context>

<pallas_src>
import functools

import jax
import jax.numpy as jnp
from jax.experimental import pallas as pl
from jax.experimental.pallas import tpu as pltpu


_LANE = 128     # vreg lane width
_SUBLANE = 8    # f32 sublane width


def _round_up(x, m):
    return ((x + m - 1) // m) * m


def _round_down(x, m):
    return (x // m) * m


def _vmem_capacity_bytes():
    """Physical VMEM per TensorCore (v5e/v6e: 128 MiB, v7x: 64 MiB)."""
    try:
        return int(pltpu.get_tpu_info().vmem_capacity_bytes)
    except Exception:
        return 64 * 1024 * 1024     # conservative default (v7x per-TC)


def _focal_loss_kernel(logits_ref, targets_ref, out_ref, *,
                       class_axis, gamma, label_smoothing):
    """One batch tile of focal loss.

    class_axis == 0: tile is (C, TB) -> batch on lanes   (small-C path)
    class_axis == 1: tile is (TB, C) -> batch on sublanes (C >= 128 path)
    All per-sample reductions keep dims so everything broadcasts naturally.
    """
    x = logits_ref[...].astype(jnp.float32)   # upcast after the (maybe bf16) load
    t = targets_ref[...]                      # int32, size-1 class axis
    num_classes = x.shape[class_axis]

    # Class indices broadcastable against the targets -- no (C, TB) iota tile.
    iota_shape = (num_classes, 1) if class_axis == 0 else (1, num_classes)
    cls = jax.lax.broadcasted_iota(jnp.int32, iota_shape, class_axis)

    # Stable log-softmax pieces; no probs tile, no persistent z = x - m tile.
    m = jnp.max(x, axis=class_axis, keepdims=True)
    sum_e = jnp.sum(jnp.exp(x - m), axis=class_axis, keepdims=True)
    x_t = jnp.sum(jnp.where(cls == t, x, 0.0), axis=class_axis, keepdims=True)

    log_denom = jnp.log(sum_e)
    log_p_t = (x_t - m) - log_denom           # log softmax at the true class
    p_t = jnp.exp(log_p_t)
    nll = -log_p_t

    if label_smoothing > 0.0:
        mean_log_probs = (jnp.mean(x, axis=class_axis, keepdims=True) - m) - log_denom
        ce = (1.0 - label_smoothing) * nll + label_smoothing * (-mean_log_probs)
    else:
        ce = nll

    # Focal weight (1 - p_t) ** gamma; clamp fp excursions p_t > 1 so the
    # general pow path never sees a negative base.
    one_minus_pt = jnp.maximum(1.0 - p_t, 0.0)
    g = float(gamma)
    if g == 0.0:
        fw = jnp.ones_like(one_minus_pt)
    elif g == float(int(g)) and 1.0 <= g <= 8.0:
        fw = one_minus_pt
        for _ in range(int(g) - 1):
            fw = fw * one_minus_pt
    else:
        # TODO(synk): non-positive, non-integer gamma is ill-defined at p_t == 1.
        fw = one_minus_pt ** g

    out_ref[...] = (fw * ce).astype(out_ref.dtype)


def _pick_batch_tile(b, align, max_tile):
    """Batch tile: a multiple of `align` (or exactly b), <= max_tile, and
    giving >= 2 grid steps when b is large enough to split across a
    megacore's two TensorCores (v7x)."""
    max_tile = max(align, _round_down(max_tile, align))
    if b <= max_tile:
        half = _round_up((b + 1) // 2, align)
        if b >= 2 * align and half < b and half <= max_tile:
            return half            # >= 2 "parallel" grid steps
        return b                   # single exact block (block == full dim)
    return max_tile


def focal_loss(logits, targets, *, gamma=2.0, label_smoothing=0.0):
    """Pallas TPU focal loss, reduction='none', alpha=None / weight=None.

    logits: (B, C) float array (f32 or bf16 -- bf16 stays bf16 in HBM and is
    only upcast inside the kernel).  targets: (B,) integer.  Returns (B,) f32.
    """
    B, C = logits.shape
    if B == 0:
        return jnp.zeros((0,), jnp.float32)
    targets_i32 = targets.astype(jnp.int32)

    # --- per-generation VMEM budget ----------------------------------------
    vmem_cap = _vmem_capacity_bytes()                       # 128 MiB v5e/v6e, 64 MiB v7x
    vmem_limit = min((vmem_cap * 3) // 4, 96 * 1024 * 1024)  # ~48 MiB v7x, 96 MiB v5e/v6e
    # Working set ~= 2 double-buffered logits blocks + a few f32 block-sized
    # temporaries; budget the (f32-equivalent) logits block at 1/8 of the limit.
    block_bytes = vmem_limit // 8

    kernel_kwargs = dict(gamma=float(gamma), label_smoothing=float(label_smoothing))
    compiler_params = pltpu.CompilerParams(
        dimension_semantics=("parallel",),       # independent batch tiles
        vmem_limit_bytes=vmem_limit,
    )
    # NOTE: if profiles on v7x still show exposed DMA with large tiles, add
    # pipeline_mode=pl.Buffered(3) on the logits BlockSpec.

    if C >= _LANE:
        # -------- natural-layout path: no transpose, no pad anywhere --------
        # Full-row (TB, C) blocks are contiguous in HBM and lane-dense.
        max_tile = block_bytes // (C * 4)
        if max_tile < _SUBLANE:
            # TODO(synk): add a class-chunked (online-softmax) grid axis for
            # huge C; the current kernel keeps the whole class row resident.
            raise ValueError(
                f"num_classes={C} too large for a single ({_SUBLANE}, {C}) f32 "
                f"block inside the {vmem_limit // 2**20} MiB VMEM budget")
        max_tile = min(max_tile, 32768)
        tb = _pick_batch_tile(B, _SUBLANE, max_tile)
        grid = (B + tb - 1) // tb

        targets_2d = targets_i32.reshape(B, 1)
        out = pl.pallas_call(
            functools.partial(_focal_loss_kernel, class_axis=1, **kernel_kwargs),
            out_shape=jax.ShapeDtypeStruct((grid * tb, 1), jnp.float32),
            grid=(grid,),
            in_specs=[
                pl.BlockSpec((tb, C), lambda i: (i, 0)),   # logits rows (input dtype)
                pl.BlockSpec((tb, 1), lambda i: (i, 0)),   # targets column
            ],
            out_specs=pl.BlockSpec((tb, 1), lambda i: (i, 0)),
            compiler_params=compiler_params,
        )(logits, targets_2d)
        return out[:B, 0]

    # ---------- small-C path: classes on sublanes, batch on lanes ----------
    # A (C, B) class-major view keeps every lane useful (C < 128 would waste
    # 1 - C/128 of each vreg in the natural layout) and keeps all per-sample
    # math and the output as dense (1, TB) rows.  The one small wrapper
    # transpose (input dtype preserved, no pad) is the documented price.
    # TODO(synk): in-kernel (TB,C)->(C,TB) XLU transpose variant for small C.
    max_tile = block_bytes // (C * 4)
    max_tile = max(_LANE, min(max_tile, 32768))
    tb = _pick_batch_tile(B, _LANE, max_tile)
    grid = (B + tb - 1) // tb

    logits_cm = jnp.transpose(logits)            # (C, B), stays bf16 if input is bf16
    targets_row = targets_i32.reshape(1, B)
    out = pl.pallas_call(
        functools.partial(_focal_loss_kernel, class_axis=0, **kernel_kwargs),
        out_shape=jax.ShapeDtypeStruct((1, grid * tb), jnp.float32),
        grid=(grid,),
        in_specs=[
            pl.BlockSpec((C, tb), lambda i: (0, i)),       # class-major logits tile
            pl.BlockSpec((1, tb), lambda i: (0, i)),       # targets row
        ],
        out_specs=pl.BlockSpec((1, tb), lambda i: (0, i)), # lane-dense output row
        compiler_params=compiler_params,
    )(logits_cm, targets_row)
    return out[0, :B]


def _focal_loss_ref(logits, targets, *, gamma=2.0, label_smoothing=0.0):
    """Plain-JAX reference mirroring the PyTorch module (alpha=None)."""
    logits = logits.astype(jnp.float32)
    log_probs = jax.nn.log_softmax(logits, axis=1)
    onehot = jax.nn.one_hot(targets, logits.shape[1], dtype=jnp.float32)
    nll = -jnp.sum(log_probs * onehot, axis=1)
    if label_smoothing > 0.0:
        smooth = -jnp.mean(log_probs, axis=1)
        ce = (1.0 - label_smoothing) * nll + label_smoothing * smooth
    else:
        ce = nll
    p_t = jnp.sum(jnp.exp(log_probs) * onehot, axis=1)
    return ((1.0 - p_t) ** gamma) * ce


if __name__ == "__main__":
    root = jax.random.PRNGKey(0)

    def _check(B, C, dtype, gamma, label_smoothing, key):
        k1, k2 = jax.random.split(key)
        logits = jax.random.normal(k1, (B, C), dtype=jnp.float32).astype(dtype)
        targets = jax.random.randint(k2, (B,), 0, C, dtype=jnp.int32)
        out = jax.block_until_ready(
            focal_loss(logits, targets, gamma=gamma, label_smoothing=label_smoothing))
        ref = _focal_loss_ref(logits, targets, gamma=gamma,
                              label_smoothing=label_smoothing)
        assert out.shape == (B,)
        assert jnp.allclose(out, ref, rtol=1e-4, atol=1e-5), (B, C, str(dtype))

    keys = jax.random.split(root, 4)
    # Small-C path (classes on sublanes, batch on lanes), 2 parallel grid steps.
    _check(256, 16, jnp.float32, 2.0, 0.0, keys[0])
    # Tiny single-block case, label-smoothing branch exercised.
    _check(8, 16, jnp.float32, 2.0, 0.005, keys[1])
    # Natural-layout path (C >= 128, no transpose), bf16 logits kept in bf16.
    _check(64, 160, jnp.bfloat16, 2.0, 0.0, keys[2])
    # Integer gamma fast path, single full block.
    _check(128, 32, jnp.float32, 3.0, 0.0, keys[3])

    print("KERNEL_OK")
</pallas_src>

<mosaic_0001>
module attributes {stable_mosaic.version = 11 : i64} {
  func.func @_focal_loss_kernel(%arg0: i32, %arg1: memref<16x128xf32, #tpu.memory_space<vmem>>, %arg2: memref<1x128xi32, #tpu.memory_space<vmem>>, %arg3: memref<1x128xf32, #tpu.memory_space<vmem>>) attributes {dimension_semantics = [#tpu.dimension_semantics<parallel>], iteration_bounds = array<i64: 2>, scalar_prefetch = 0 : i64, scratch_operands = 0 : i64, tpu.core_type = #tpu.core_type<tc>, window_params = [{transform_indices = @transform_0, window_bounds = array<i64: 16, 128>}, {transform_indices = @transform_1, window_bounds = array<i64: 1, 128>}, {transform_indices = @transform_2, window_bounds = array<i64: 1, 128>}]} {
    %c0 = arith.constant 0 : index
    %c0_0 = arith.constant 0 : index
    %0 = vector.load %arg1[%c0, %c0_0] : memref<16x128xf32, #tpu.memory_space<vmem>>, vector<16x128xf32>
    %c0_1 = arith.constant 0 : index
    %c0_2 = arith.constant 0 : index
    %1 = vector.load %arg2[%c0_1, %c0_2] : memref<1x128xi32, #tpu.memory_space<vmem>>, vector<1x128xi32>
    %2 = tpu.iota {dimensions = array<i32: 0>} : vector<16x1xi32>
    %cst = arith.constant dense<0xFF800000> : vector<128xf32>
    %3 = vector.multi_reduction <maximumf>, %0, %cst [0] : vector<16x128xf32> to vector<128xf32>
    %4 = vector.shape_cast %3 : vector<128xf32> to vector<1x128xf32>
    %5 = vector.broadcast %4 : vector<1x128xf32> to vector<16x128xf32>
    %6 = arith.subf %0, %5 : vector<16x128xf32>
    %7 = math.exp %6 : vector<16x128xf32>
    %cst_3 = arith.constant dense<0.000000e+00> : vector<128xf32>
    %8 = vector.multi_reduction <add>, %7, %cst_3 [0] : vector<16x128xf32> to vector<128xf32>
    %9 = vector.shape_cast %8 : vector<128xf32> to vector<1x128xf32>
    %10 = vector.broadcast %2 : vector<16x1xi32> to vector<16x128xi32>
    %11 = vector.broadcast %1 : vector<1x128xi32> to vector<16x128xi32>
    %12 = arith.cmpi eq, %10, %11 : vector<16x128xi32>
    %cst_4 = arith.constant 0.000000e+00 : f32
    %13 = vector.broadcast %cst_4 : f32 to vector<16x128xf32>
    %14 = arith.select %12, %0, %13 : vector<16x128xi1>, vector<16x128xf32>
    %cst_5 = arith.constant dense<0.000000e+00> : vector<128xf32>
    %15 = vector.multi_reduction <add>, %14, %cst_5 [0] : vector<16x128xf32> to vector<128xf32>
    %16 = vector.shape_cast %15 : vector<128xf32> to vector<1x128xf32>
    %17 = math.log %9 : vector<1x128xf32>
    %18 = arith.subf %16, %4 : vector<1x128xf32>
    %19 = arith.subf %18, %17 : vector<1x128xf32>
    %20 = math.exp %19 : vector<1x128xf32>
    %cst_6 = arith.constant 0.000000e+00 : f32
    %21 = vector.broadcast %cst_6 : f32 to vector<1x128xf32>
    %22 = arith.subf %21, %19 : vector<1x128xf32>
    %cst_7 = arith.constant 1.000000e+00 : f32
    %23 = vector.broadcast %cst_7 : f32 to vector<1x128xf32>
    %24 = arith.subf %23, %20 : vector<1x128xf32>
    %cst_8 = arith.constant 0.000000e+00 : f32
    %25 = vector.broadcast %cst_8 : f32 to vector<1x128xf32>
    %26 = arith.maximumf %24, %25 : vector<1x128xf32>
    %27 = arith.mulf %26, %26 : vector<1x128xf32>
    %28 = arith.mulf %27, %22 : vector<1x128xf32>
    %c0_9 = arith.constant 0 : index
    %c0_10 = arith.constant 0 : index
    %29 = vector.load %arg3[%c0_9, %c0_10] : memref<1x128xf32, #tpu.memory_space<vmem>>, vector<1x128xf32>
    tpu.vector_store %arg3[%c0_9, %c0_10], %28 {strides = array<i32>} : memref<1x128xf32, #tpu.memory_space<vmem>>, vector<1x128xf32>,
    return
  }
  func.func @transform_0(%arg0: i32) -> (i32, i32) {
    %c0_i32 = arith.constant 0 : i32
    %c0_i32_0 = arith.constant 0 : i32
    return %c0_i32, %arg0 : i32, i32
  }
  func.func @transform_1(%arg0: i32) -> (i32, i32) {
    %c0_i32 = arith.constant 0 : i32
    %c0_i32_0 = arith.constant 0 : i32
    return %c0_i32, %arg0 : i32, i32
  }
  func.func @transform_2(%arg0: i32) -> (i32, i32) {
    %c0_i32 = arith.constant 0 : i32
    %c0_i32_0 = arith.constant 0 : i32
    return %c0_i32, %arg0 : i32, i32
  }
}

</mosaic_0001>

<bundles_post_ra>
// kernel: tpu_custom_call.1
= control target key start
LH: loop header
LB: loop body
LE: loop exit
PB: predicated region body
PF: predicated region fallthrough
CT: control target
= control target key end

     0   :  { %7 = vsyncpa [#allocation3], 0  ;;  %s729_s0 = inlined_call_operand.hbm [shape: f32[16,256], index: 0, kind: input, shape index: {}]   ;;  %s730_s1 = inlined_call_operand.hbm [shape: s32[1,256], index: 1, kind: input, shape index: {}]   ;;  %s731_s2 = inlined_call_operand.hbm [shape: f32[1,256], index: 2, kind: output, shape index: {}]  }
   0x1   :  { %9 = vsyncpa [#allocation3 + $0x1], 0 }
   0x2   :  { %10 = vsyncpa [#allocation6], 0 }
   0x3   :  { %12 = vsyncpa [#allocation6 + $0x1], 0 }
   0x4   :  { %13 = vsyncpa [#allocation4], 0 }
   0x5   :  { %15 = vsyncpa [#allocation4 + $0x1], 0  ;;  %s567_s9 = smov 0   ;;  %s569_s10 = smov 0  }
   0x6   :  { %s571_s11 = smov 0   ;;  %s573_s12 = smov 0  }
   0x7 LB: > { %s588_s13 = sadd.s32 4294967295, %s547_s12   ;;  %s345_s14 = sadd.s32 4294967294, %s547_s12   ;;  %s547_s12 = sphi %s573_s12, %s741_s12   ;;  %s543_s11 = sphi %s571_s11, %s740_s11   ;;  %s539_s10 = sphi %s569_s10, %s739_s10   ;;  %s535_s9 = sphi %s567_s9, %s738_s9  }
   0x8   : > { %s592_s15 = sadd.s32 1, %s547_s12   ;;  %s28_s16 = sadd.s32 1, %s543_s11 }
   0x9   : > { %s25_s17 = ssub.s32 %s547_s12, %s592_s15  ;;  %p35_p0 = scmp.ne.s32.totalorder %s543_s11, %s539_s10 }
   0xa   : > { %p26_p1 = scmp.eq.s32.totalorder %s25_s17, 0  ;;  %p36_p2 = scmp.eq.s32.totalorder %s547_s12, 0 }
   0xb   : > { %p41_p3 = scmp.ne.s32.totalorder %s539_s10, %s535_s9  ;;  %p42_p4 = scmp.eq.s32.totalorder %s588_s13, 0 }
   0xc   : > { %s604_s18 = scalar_select %p26_p1, %s543_s11, %s28_s16  }
   0xd   : > { %p606_p5 = por %p36_p2, %p35_p0  ;;  %p610_p6 = por %p42_p4, %p41_p3 }
   0xe   : > { %p91_p7 = scmp.eq.s32.totalorder %s588_s13, 1  ;;  %p97_p8 = scmp.eq.s32.totalorder %s345_s14, 1 }
   0xf   : > { %p347_p9 = scmp.ge.s32.totalorder %s547_s12, 2  ;;  %p371_p10 = scmp.lt.s32.totalorder %s547_s12, 2 }
  0x10   : > { %p617_p11 = por %p91_p7, %p35_p0  ;;  %p621_p12 = por %p97_p8, %p41_p3 }
  0x11   : > { %s626_s23 = sand.u32 1, %s543_s11   ;;  %s349_s24 = sshll.u32 %s547_s12, 3 }
  0x12   : > { %s348_s25 = sshll.u32 %s626_s23, 4  ;;  %s125_s28 = scalar_lea.hbm %s729_s0, %s349_s24 }
  0x13   : > { %s126_s29 = sshll.u32 %s125_s28, 4  ;;  %s121_s30 = scalar_lea.vmem [#allocation2], %s348_s25  ;;  %s127_s29 = int_to_ptr.hbm [resolvable:$true] %s126_s29 }
  0x14   : > { %s128_s3 = sshll.u32 %s121_s30, 4  ;;  %p635_p13 = pnand %p371_p10, %p606_p5  ;;  %s129_s3 = int_to_ptr.vmem [resolvable:$true] %s128_s3 }
  0x15   : > { %p350_p0 = scmp.ge.s32.totalorder %s547_s12, 1  ;;  %s118_s5 = scalar_lea.sflag [#allocation3], %s626_s23 }
  0x16   : > { %s417_s6 = sshra.s32 %s127_s29, 4  ;;  %p421_p2 = pneg %p635_p13  ;;  %s418_s6 = int_to_ptr.hbm [resolvable:$true] %s417_s6 }
  0x17   : > { %s419_s7 = scalar_lea.hbm %s418_s6, 16  ;;  %s424_s16 = scalar_lea.hbm %s729_s0, 32 }
  0x18   : > { %p420_p1 = scmp.ne.s32.totalorder %s418_s6, %s419_s7  ;;  %p425_p5 = scmp.lt.s32.totalorder %s418_s6, %s729_s0 }
  0x19   : > { %p426_p7 = scmp.lt.s32.totalorder %s424_s16, %s419_s7 }
  0x1a   : > { %p422_p3 = pnand %p421_p2, %p420_p1 }
  0x1b   : > { %p427_p8 = por %p426_p7, %p425_p5 }
  0x1c   : > { %p423_p4 = pneg %p422_p3 }
  0x1e   : > { %p428_p10 = pnand %p427_p8, %p423_p4 }
  0x20   : > { %431 = shalt.err (!%p428_p10)
}
  0x21   : > { %s549_s24 = smov 256   ;;  %s550_s25 = smov 128  }
  0x22   : > { %s551_s26 = smov 8   ;;  %p153_p1 = scmp.lt.s32.totalorder %s547_s12, 3 }
  0x23   : > { %363 = dma.hbm_to_vmem [thread:$0]  (!%p635_p13), %s127_s29, 256, %s129_s3, %s118_s5, %s549_s24, %s550_s25, %s551_s26  }
  0x24   : > { %s144_s30 = scalar_lea.hbm %s730_s1, %s547_s12  ;;  %p661_p3 = pnand %p350_p0, %p153_p1 }
  0x25   : > { %s146_s7 = sshll.u32 %s144_s30, 4  ;;  %s141_s8 = scalar_lea.vmem [#allocation5], %s626_s23  ;;  %s147_s7 = int_to_ptr.hbm [resolvable:$true] %s146_s7 }
  0x26   : > { %s148_s14 = sshll.u32 %s141_s8, 4  ;;  %s139_s16 = scalar_lea.sflag [#allocation6], %s626_s23  ;;  %s149_s14 = int_to_ptr.vmem [resolvable:$true] %s148_s14 }
  0x27   : > { %s447_s17 = sshra.s32 %s147_s7, 4  ;;  %s454_s5 = scalar_lea.hbm %s730_s1, 2  ;;  %s448_s17 = int_to_ptr.hbm [resolvable:$true] %s447_s17 }
  0x28   : > { %s449_s19 = scalar_lea.hbm %s448_s17, 1  ;;  %p455_p0 = scmp.lt.s32.totalorder %s448_s17, %s730_s1 }
  0x29   : > { %p450_p4 = scmp.ne.s32.totalorder %s448_s17, %s449_s19  ;;  %p456_p8 = scmp.lt.s32.totalorder %s454_s5, %s449_s19 }
  0x2b   : > { %p452_p5 = pnand %p450_p4, %p421_p2  ;;  %p457_p10 = por %p456_p8, %p455_p0 }
  0x2d   : > { %p453_p7 = pneg %p452_p5 }
  0x2f   : > { %p458_p1 = pnand %p457_p10, %p453_p7 }
  0x31   : > { %461 = shalt.err (!%p458_p1)
}
  0x32   : > { %366 = dma.hbm_to_vmem [thread:$0]  (!%p635_p13), %s147_s7, 16, %s149_s14, %s139_s16  }
  0x33   : > { %157 = sbr.rel (%p661_p3) target bundleno = 131 (0x83), region = 28  ;;  %s681_s23 = sand.u32 (!%p661_p3), 1, %s539_s10  }
  0x34   : > { %s351_s26 = sshll.u32 (!%p661_p3), %s681_s23, 4  ;;  %s160_s27 = scalar_lea.sflag (!%p661_p3), [#allocation3], %s681_s23 }
  0x35   : > { %s163_s28 = scalar_lea.vmem (!%p661_p3), [#allocation2], %s351_s26 }
  0x38   : > { %522 = dma.done.wait (%p610_p6), %s160_s27, 256  }
  0x39   : > { %524 = vsyncadd (%p610_p6), %s160_s27, 4294967040  ;;  %s170_s4 = scalar_lea.sflag [#allocation6], %s681_s23  ;;  %s172_s30 = scalar_lea.vmem [#allocation5], %s681_s23 }
  0x3a   : > { %526 = dma.done.wait (%p610_p6), %s170_s4, 16  }
  0x3b   : > { %528 = vsyncadd (%p610_p6), %s170_s4, 4294967280  ;;  %v197_v0 = vld [vmem:[%s163_s28] sm:$0xff]  ;;  %v198_v1 = vld [vmem:[%s163_s28 + $0x8] sm:$0xff]  ;;  %v200_v2 = vlaneseq  ;;  %s256_s7 = scalar_lea.hbm %s731_s2, %s588_s13  ;;  %s196_s8 = scalar_lea.vmem [#allocation7], %s681_s23 }
  0x3c   : > { %v203_v3 = vmax.f32 %v197_v0, %v198_v1  ;;  %v408_v9 = vld [vmem:[%s172_s30] ss:$0 sm:$0xff]  ;;  %s258_s14 = sshll.u32 %s196_s8, 4  ;;  %s260_s16 = sshll.u32 %s256_s7, 4  ;;  %s259_s14 = int_to_ptr.vmem [resolvable:$true] %s258_s14  ;;  %s261_s16 = int_to_ptr.hbm [resolvable:$true] %s260_s16 }
  0x3d   : > { %v201_v5 = vshrl.u32 %v200_v2, 7  ;;  %s248_s17 = scalar_lea.sflag [#allocation4], %s681_s23  ;;  %s491_s19 = sshra.s32 %s261_s16, 4  ;;  %s492_s19 = int_to_ptr.hbm [resolvable:$true] %s491_s19 }
  0x3e   : > { %v204_v4 = vrot.slane %v203_v3, 4  ;;  %s493_s29 = scalar_lea.hbm %s492_s19, 1  ;;  %s497_s5 = scalar_lea.hbm %s731_s2, 2 }
  0x3f   : > { %v202_v8 = vadd.s32 8, %v201_v5  ;;  %vm224_vm0 = vcmp.eq.s32.totalorder %v201_v5, %v408_v9  ;;  %p494_p6 = scmp.ne.s32.totalorder %s492_s19, %s493_s29  ;;  %p498_p3 = scmp.lt.s32.totalorder %s492_s19, %s731_s2 }
  0x40   : > { %v205_v6 = vmax.f32 %v203_v3, %v204_v4  ;;  %v226_v15 = vsel %vm224_vm0, %v197_v0, 0.0  ;;  %p499_p4 = scmp.lt.s32.totalorder %s497_s5, %s493_s29 }
  0x41   : > { %vm225_vm1 = vcmp.eq.s32.totalorder %v202_v8, %v408_v9  ;;  %p495_p13 = pnand %p494_p6, %p617_p11 }
  0x42   : > { %v206_v7 = vrot.slane %v205_v6, 2  ;;  %v227_v16 = vsel %vm225_vm1, %v198_v1, 0.0  ;;  %p500_p5 = por %p499_p4, %p498_p3 }
  0x43   : > { %v228_v19 = vadd.f32 %v227_v16, %v226_v15  ;;  %p496_p2 = pneg %p495_p13 }
  0x44   : > { %v207_v10 = vmax.f32 %v205_v6, %v206_v7 }
  0x45   : > { %v229_v20 = vrot.slane %v228_v19, 4  ;;  %p501_p7 = pnand %p500_p5, %p496_p2 }
  0x46   : > { %v208_v11 = vrot.slane %v207_v10, 1 }
  0x47   : > { %v230_v23 = vadd.f32 %v229_v20, %v228_v19 }
  0x48   : > { %v209_v12 = vmax.f32 %v207_v10, %v208_v11 }
  0x49   : > { %v231_v26 = vrot.slane %v230_v23, 2 }
  0x4a   : > { %v210_v13 = vsub.f32 %v197_v0, %v209_v12  ;;  %v211_v14 = vsub.f32 %v198_v1, %v209_v12 }
  0x4b   : > { %v232_v29 = vadd.f32 %v231_v26, %v230_v23 }
  0x4c   : > { %v212_v17 = vmul.f32 1.442695, %v210_v13  ;;  %v214_v18 = vmul.f32 1.442695, %v211_v14 }
  0x4d   : > { %v233_v32 = vrot.slane %v232_v29, 1 }
  0x4e   : > { %409 = vpow2.f32 %v212_v17 }
  0x4f   : > { %411 = vpow2.f32 %v214_v18  ;;  %v234_v34 = vadd.f32 %v233_v32, %v232_v29 }
  0x51   : > { %v237_v35 = vsub.f32 %v234_v34, %v209_v12 }
  0x54   : > { %v410_v21 = vpop.eup %409 }
  0x55   : > { %v412_v22 = vpop.eup %411 }
  0x56   : > { %v216_v24 = vadd.f32 %v412_v22, %v410_v21 }
  0x58   : > { %v217_v25 = vrot.slane %v216_v24, 4 }
  0x5a   : > { %v218_v27 = vadd.f32 %v217_v25, %v216_v24 }
  0x5c   : > { %v219_v28 = vrot.slane %v218_v27, 2 }
  0x5e   : > { %v220_v30 = vadd.f32 %v219_v28, %v218_v27 }
  0x60   : > { %v221_v31 = vrot.slane %v220_v30, 1 }
  0x62   : > { %v222_v33 = vadd.f32 %v221_v31, %v220_v30 }
  0x64   : > { %413 = vlog2.f32 %v222_v33 }
  0x6a   : > { %v414_v36 = vpop.eup %413 }
  0x6b   : > { %v236_v37 = vmul.f32 0.6931472, %v414_v36 }
  0x6d   : > { %v238_v38 = vsub.f32 %v237_v35, %v236_v37 }
  0x6f   : > { %v239_v39 = vmul.f32 1.442695, %v238_v38  ;;  %v241_v42 = vsub.f32 0.0, %v238_v38 }
  0x71   : > { %415 = vpow2.f32 %v239_v39 }
  0x77   : > { %v416_v40 = vpop.eup %415 }
  0x78   : > { %v242_v41 = vsub.f32 1.0, %v416_v40 }
  0x7a   : > { %v243_v43 = vmax.f32 %v242_v41, 0.0 }
  0x7c   : > { %v244_v44 = vmul.f32 %v243_v43, %v243_v43 }
  0x7e   : > { %v245_v45 = vmul.f32 %v244_v44, %v241_v42 }
  0x80   : > { %246 = vst [vmem:[%s196_s8] sm:$0x1] %v245_v45 }
  0x81   : > { %504 = shalt.err (!%p501_p7)
}
  0x82   : > { %358 = dma.vmem_to_hbm [thread:$0]  (%p617_p11), %s259_s14, 16, %s261_s16, %s248_s17  }
  0x83 PF: > { %s272_s23 = sand.u32 1, %s535_s9   ;;  %p368_p0 = pnand %p347_p9, %p621_p12 }
  0x84   : > { %s273_s26 = scalar_lea.sflag [#allocation4], %s272_s23 }
  0x85   : > { %p369_p8 = pneg %p368_p0 }
  0x87   : > { %530 = dma.done.wait (%p369_p8), %s273_s26, 16  }
  0x88   : > { %532 = vsyncadd (%p369_p8), %s273_s26, 4294967280  ;;  %p18_p10 = scmp.ge.s32.totalorder %s592_s15, 4   ;;  %s738_s9 = smov %s539_s10 }
  0x89   : > { %s739_s10 = smov %s543_s11  ;;  %s740_s11 = smov %s604_s18 }
  0x8a   : > { %s741_s12 = smov %s592_s15  ;;  %20 = sbr.rel (!%p18_p10) target bundleno = 7 (0x7), region = 86 }
  0x8f   :  { %278 = vsyncpa [#allocation3], 1 }
  0x90   :  { %280 = vsyncpa [#allocation3 + $0x1], 1 }
  0x91   :  { %281 = vsyncpa [#allocation6], 1 }
  0x92   :  { %283 = vsyncpa [#allocation6 + $0x1], 1 }
  0x93   :  { %284 = vsyncpa [#allocation4], 1 }
  0x94   :  { %286 = vsyncpa [#allocation4 + $0x1], 1 }

</bundles_post_ra>
